<compile_context>
chip_gen: v7x
topology: tpu7x:2x2x1
jax: 0.10.0
libtpu: 0.0.40
codegen_flags: <defaults>
</compile_context>

<pallas_src>
import jax
import jax.numpy as jnp
from jax.experimental import pallas as pl
from jax.experimental.pallas import tpu as pltpu

EPS = 1e-10


def _round_up(x, m):
    return ((x + m - 1) // m) * m


def _l2norm_kernel(x_ref, w_ref, o_ref):
    # x_ref : (1, C, T)  one (batch, spatial-tile) block per grid step
    # w_ref : (1, C)     per-channel scale (same block every step)
    x = x_ref[...]
    w = w_ref[...]
    # Sum of squares over the channel (sublane) axis; intermediates stay at
    # (1, 1, T) -- no (1, C, T) broadcast is materialized.
    sq = jnp.sum(x * x, axis=1, keepdims=True)                 # (1, 1, T)
    inv = pl.reciprocal(jnp.sqrt(sq) + EPS, approx=False)      # (1, 1, T)
    o_ref[...] = x * inv * w[:, :, None]                       # broadcast mults


def l2norm(x, weight, *, max_lane_tile=2048):
    """x: (N, C, H, W) float32, weight: (C,) float32 -> (N, C, H, W)."""
    N, C, H, W = x.shape
    hw = H * W

    # Lane tile: a multiple of 128, capped (VMEM-friendly on v7x's 64 MiB).
    T = min(max_lane_tile, _round_up(hw, 128))
    hw_pad = _round_up(hw, T)

    x_flat = x.reshape(N, C, hw)
    if hw_pad != hw:
        x_flat = jnp.pad(x_flat, ((0, 0), (0, 0), (0, hw_pad - hw)))
    w2 = weight.reshape(1, C)

    n_hw_tiles = hw_pad // T

    out_flat = pl.pallas_call(
        _l2norm_kernel,
        out_shape=jax.ShapeDtypeStruct((N, C, hw_pad), x.dtype),
        grid=(N, n_hw_tiles),
        in_specs=[
            pl.BlockSpec((1, C, T), lambda n, t: (n, 0, t)),
            pl.BlockSpec((1, C), lambda n, t: (0, 0)),
        ],
        out_specs=pl.BlockSpec((1, C, T), lambda n, t: (n, 0, t)),
        compiler_params=pltpu.CompilerParams(
            dimension_semantics=("parallel", "parallel")
        ),
    )(x_flat, w2)

    if hw_pad != hw:
        out_flat = out_flat[:, :, :hw]
    return out_flat.reshape(N, C, H, W)


if __name__ == "__main__":
    # Module params: n_channels=4, scale=20.0 (typical SSD value).
    # reset_parameters() sets every weight entry to `scale` (constant_ init).
    n_channels = 4
    scale = 20.0
    weight = jnp.full((n_channels,), scale, dtype=jnp.float32)

    key = jax.random.PRNGKey(0)
    x = jax.random.normal(key, (2, n_channels, 16, 16), dtype=jnp.float32)

    out = l2norm(x, weight)
    out = jax.block_until_ready(out)

    # Reference check in plain JAX (same semantics as the PyTorch forward).
    norm = jnp.sqrt(jnp.sum(x * x, axis=1, keepdims=True)) + EPS
    ref = (x / norm) * weight[None, :, None, None]
    assert out.shape == x.shape and out.dtype == x.dtype
    assert jnp.allclose(out, ref, atol=1e-5, rtol=1e-5)

    print("KERNEL_OK")
</pallas_src>

<mosaic_0001>
module attributes {stable_mosaic.version = 11 : i64} {
  func.func @_l2norm_kernel(%arg0: i32, %arg1: i32, %arg2: memref<1x4x256xf32, #tpu.memory_space<vmem>>, %arg3: memref<1x4xf32, #tpu.memory_space<vmem>>, %arg4: memref<1x4x256xf32, #tpu.memory_space<vmem>>) attributes {dimension_semantics = [#tpu.dimension_semantics<parallel>, #tpu.dimension_semantics<parallel>], iteration_bounds = array<i64: 2, 1>, scalar_prefetch = 0 : i64, scratch_operands = 0 : i64, tpu.core_type = #tpu.core_type<tc>, window_params = [{transform_indices = @transform_0, window_bounds = array<i64: 1, 4, 256>}, {pipeline_mode = #tpu.pipeline_mode<synchronous>, transform_indices = @transform_1, window_bounds = array<i64: 1, 4>}, {transform_indices = @transform_2, window_bounds = array<i64: 1, 4, 256>}]} {
    %c0 = arith.constant 0 : index
    %c0_0 = arith.constant 0 : index
    %c0_1 = arith.constant 0 : index
    %0 = vector.load %arg2[%c0, %c0_0, %c0_1] : memref<1x4x256xf32, #tpu.memory_space<vmem>>, vector<1x4x256xf32>
    %c0_2 = arith.constant 0 : index
    %c0_3 = arith.constant 0 : index
    %1 = vector.load %arg3[%c0_2, %c0_3] : memref<1x4xf32, #tpu.memory_space<vmem>>, vector<1x4xf32>
    %2 = arith.mulf %0, %0 : vector<1x4x256xf32>
    %cst = arith.constant dense<0.000000e+00> : vector<1x256xf32>
    %3 = vector.multi_reduction <add>, %2, %cst [1] : vector<1x4x256xf32> to vector<1x256xf32>
    %4 = vector.shape_cast %3 : vector<1x256xf32> to vector<1x1x256xf32>
    %5 = math.sqrt %4 : vector<1x1x256xf32>
    %cst_4 = arith.constant 1.000000e-10 : f32
    %6 = vector.broadcast %cst_4 : f32 to vector<1x1x256xf32>
    %7 = arith.addf %5, %6 : vector<1x1x256xf32>
    %8 = tpu.reciprocal %7 : vector<1x1x256xf32> -> vector<1x1x256xf32>
    %9 = vector.broadcast %8 : vector<1x1x256xf32> to vector<1x4x256xf32>
    %10 = arith.mulf %0, %9 : vector<1x4x256xf32>
    %11 = vector.shape_cast %1 : vector<1x4xf32> to vector<1x4x1xf32>
    %12 = vector.broadcast %11 : vector<1x4x1xf32> to vector<1x4x256xf32>
    %13 = arith.mulf %10, %12 : vector<1x4x256xf32>
    %c0_5 = arith.constant 0 : index
    %c0_6 = arith.constant 0 : index
    %c0_7 = arith.constant 0 : index
    %14 = vector.load %arg4[%c0_5, %c0_6, %c0_7] : memref<1x4x256xf32, #tpu.memory_space<vmem>>, vector<1x4x256xf32>
    tpu.vector_store %arg4[%c0_5, %c0_6, %c0_7], %13 {strides = array<i32>} : memref<1x4x256xf32, #tpu.memory_space<vmem>>, vector<1x4x256xf32>,
    return
  }
  func.func @transform_0(%arg0: i32, %arg1: i32) -> (i32, i32, i32) {
    %c0_i32 = arith.constant 0 : i32
    %c0_i32_0 = arith.constant 0 : i32
    return %arg0, %c0_i32, %arg1 : i32, i32, i32
  }
  func.func @transform_1(%arg0: i32, %arg1: i32) -> (i32, i32) {
    %c0_i32 = arith.constant 0 : i32
    %c0_i32_0 = arith.constant 0 : i32
    %c0_i32_1 = arith.constant 0 : i32
    return %c0_i32, %c0_i32_0 : i32, i32
  }
  func.func @transform_2(%arg0: i32, %arg1: i32) -> (i32, i32, i32) {
    %c0_i32 = arith.constant 0 : i32
    %c0_i32_0 = arith.constant 0 : i32
    return %arg0, %c0_i32, %arg1 : i32, i32, i32
  }
}

</mosaic_0001>

<bundles_post_ra>
// kernel: tpu_custom_call.1
= control target key start
LH: loop header
LB: loop body
LE: loop exit
PB: predicated region body
PF: predicated region fallthrough
CT: control target
= control target key end

     0   :  { %7 = vsyncpa [#allocation3], 0  ;;  %s743_s0 = inlined_call_operand.hbm [shape: f32[2,4,256], index: 0, kind: input, shape index: {}]   ;;  %s744_s1 = inlined_call_operand.vmem [shape: f32[1,4], index: 1, kind: input, shape index: {}]   ;;  %s745_s2 = inlined_call_operand.hbm [shape: f32[2,4,256], index: 2, kind: output, shape index: {}]  }
   0x1   :  { %9 = vsyncpa [#allocation3 + $0x1], 0 }
   0x2   :  { %10 = vsyncpa [#allocation4], 0 }
   0x3   :  { %12 = vsyncpa [#allocation4 + $0x1], 0  ;;  %s564_s9 = smov 0   ;;  %s566_s10 = smov 0  }
   0x4   :  { %s568_s11 = smov 0   ;;  %s570_s12 = smov 0  }
   0x5   :  { %s572_s13 = smov 0   ;;  %s574_s14 = smov 0  }
   0x6 LB: > { %s343_s15 = sadd.s32 4294967295, %s544_s14   ;;  %s344_s16 = sadd.s32 4294967294, %s544_s14   ;;  %s544_s14 = sphi %s574_s14, %s18_s14   ;;  %s540_s13 = sphi %s572_s13, %s761_s13   ;;  %s536_s12 = sphi %s570_s12, %s760_s12   ;;  %s532_s11 = sphi %s568_s11, %s759_s11   ;;  %s528_s10 = sphi %s566_s10, %s758_s10   ;;  %s524_s9 = sphi %s564_s9, %s757_s9  }
   0x7   : > { %s30_s17 = sadd.s32 1, %s540_s13  ;;  %s39_s18 = sadd.s32 1, %s532_s11 }
   0x8   : > { %p32_p0 = scmp.ge.s32.totalorder %s30_s17, 2  ;;  %p46_p1 = scmp.ne.s32.totalorder %s532_s11, %s528_s10 }
   0x9   : > { %p47_p2 = scmp.eq.s32.totalorder %s544_s14, 0  ;;  %p52_p3 = scmp.ne.s32.totalorder %s528_s10, %s524_s9 }
   0xa   : > { %s763_s17 = smov (%p32_p0, %s30_s17), 0  ;;  %p53_p5 = scmp.eq.s32.totalorder %s343_s15, 0 }
   0xb   : > { %p605_p4 = por %p47_p2, %p46_p1  ;;  %s34_s20 = ssub.s32 %s540_s13, %s763_s17 }
   0xc   : > { %p99_p6 = scmp.eq.s32.totalorder %s343_s15, 1  ;;  %p37_p7 = scmp.eq.s32.totalorder %s34_s20, 0 }
   0xd   : > { %p611_p8 = por %p53_p5, %p52_p3  ;;  %p105_p10 = scmp.eq.s32.totalorder %s344_s16, 1 }
   0xe   : > { %p615_p9 = por %p99_p6, %p46_p1  ;;  %p373_p13 = scmp.lt.s32.totalorder %s544_s14, 2 }
   0xf   : > { %s620_s23 = scalar_select %p37_p7, %s532_s11, %s39_s18  }
  0x10   : > { %s749_s22 = scalar_select %p615_p9, 1, 0 }
  0x11   : > { %p622_p11 = por %p105_p10, %p52_p3  ;;  %s128_s25 = sand.u32 1, %s532_s11  }
  0x12   : > { %s347_s26 = sshll.u32 %s128_s25, 3  ;;  %s359_s27 = sshll.u32 %s540_s13, 7 }
  0x13   : > { %s750_s24 = scalar_select %p622_p11, 1, 0 }
  0x14   : > { %s633_s30 = scalar_lea.hbm %s743_s0, %s359_s27  ;;  %s132_s3 = scalar_lea.vmem [#allocation2], %s347_s26 }
  0x15   : > { %s142_s4 = sshll.u32 %s132_s3, 4  ;;  %p639_p0 = pnand %p373_p13, %p605_p4  ;;  %s635_s4 = int_to_ptr.vmem [resolvable:$true] %s142_s4 }
  0x16   : > { %s129_s6 = scalar_lea.sflag [#allocation3], %s128_s25  ;;  %s432_s7 = scalar_lea.hbm %s633_s30, 128 }
  0x17   : > { %p433_p3 = scmp.ne.s32.totalorder %s633_s30, %s432_s7  ;;  %p434_p5 = pneg %p639_p0 }
  0x18   : > { %s437_s16 = scalar_lea.hbm %s743_s0, 256  ;;  %p438_p4 = scmp.lt.u32.totalorder %s633_s30, %s743_s0 }
  0x19   : > { %p435_p6 = pnand %p434_p5, %p433_p3  ;;  %p439_p10 = scmp.lt.u32.totalorder %s437_s16, %s432_s7 }
  0x1a   : > { %p441_p12 = scmp.lt.u32.totalorder %s432_s7, %s633_s30 }
  0x1b   : > { %p436_p7 = pneg %p435_p6  ;;  %p440_p13 = por %p439_p10, %p438_p4 }
  0x1d   : > { %p442_p1 = por %p441_p12, %p440_p13 }
  0x1f   : > { %p443_p2 = pnand %p442_p1, %p436_p7 }
  0x21   : > { %446 = shalt.err (!%p443_p2)
}
  0x22   : > { %s447_s20 = scalar_lea.vmem %s635_s4, 128  ;;  %s546_s25 = smov [#allocation2]  }
  0x23   : > { %p448_p3 = scmp.ne.s32.totalorder %s635_s4, %s447_s20  ;;  %s452_s26 = sshll.u32 %s546_s25, 4  ;;  %s453_s26 = int_to_ptr.vmem [resolvable:$false] %s452_s26 }
  0x24   : > { %s454_s27 = scalar_lea.vmem %s453_s26, 256  ;;  %p455_p9 = scmp.lt.s32.totalorder %s635_s4, %s453_s26 }
  0x25   : > { %p450_p6 = pnand %p448_p3, %p434_p5  ;;  %p456_p4 = scmp.lt.s32.totalorder %s454_s27, %s447_s20 }
  0x27   : > { %p451_p11 = pneg %p450_p6  ;;  %p457_p10 = por %p456_p4, %p455_p9 }
  0x29   : > { %p458_p12 = pnand %p457_p10, %p451_p11 }
  0x2b   : > { %461 = shalt.err (!%p458_p12)
}
  0x2c   : > { %368 = dma.hbm_to_vmem [thread:$0]  (!%p639_p0), %s633_s30, 128, %s635_s4, %s129_s6  }
  0x2d   : > { %p752_p1 = scmp.lt.s32.totalorder %s544_s14, 3  ;;  %p753_p2 = scmp.ge.s32.totalorder %s544_s14, 1 }
  0x2f   : > { %p148_p5 = pnand %p753_p2, %p752_p1 }
  0x30   : > { %s675_s28 = sand.u32 (!%p148_p5), 1, %s528_s10  }
  0x31   : > { %151 = sbr.rel (%p148_p5) target bundleno = 191 (0xbf), region = 28  ;;  %s351_s29 = sshll.u32 (!%p148_p5), %s675_s28, 3 }
  0x32   : > { %s154_s3 = scalar_lea.sflag (!%p148_p5), [#allocation3], %s675_s28  ;;  %s157_s5 = scalar_lea.vmem (!%p148_p5), [#allocation2], %s351_s29 }
  0x38   : > { %515 = dma.done.wait (%p611_p8), %s154_s3, 128  }
  0x39   : > { %517 = vsyncadd (%p611_p8), %s154_s3, 4294967168  ;;  %v353_v0 = vld [vmem:[%s744_s1] ss:$0 sm:$0xff]  ;;  %vm186_vm0 = vcmask 1043456   ;;  %v547_v30 = vmov 839922192   ;;  %v235_v32 = vlaneseq }
  0x3a   : > { %229 = vbcast.lane.b32.xlu0 %v353_v0, 256  ;;  %v180_v1 = vld [vmem:[%s157_s5] sm:$0xff]  ;;  %v233_v31 = vunpack.c.l.s4 %v547_v30  ;;  %s360_s21 = sshll.u32 %s536_s12, 7  ;;  %s177_s6 = scalar_lea.vmem [#allocation5], %s351_s29 }
  0x3b   : > { %v182_v2 = vmul.f32 %v180_v1, %v180_v1  ;;  %v236_v36 = vshrl.u32 %v235_v32, 7  ;;  %s259_s7 = sshll.u32 %s177_s6, 4  ;;  %s694_s16 = scalar_lea.hbm %s745_s2, %s360_s21  ;;  %s696_s7 = int_to_ptr.vmem [resolvable:$true] %s259_s7 }
  0x3c   : > { %v234_v35 = vunpack.c.0.s8 %v233_v31  ;;  %s243_s18 = scalar_lea.sflag [#allocation4], %s675_s28  ;;  %s462_s19 = scalar_lea.vmem %s696_s7, 128 }
  0x3d   : > { %v184_v3 = vcombine.high %v182_v2, %v182_v2  ;;  %v187_v4 = vsel %vm186_vm0, %v182_v2, 0.0  ;;  %p463_p8 = scmp.ne.s32.totalorder %s696_s7, %s462_s19  ;;  %p754_p9 = scmp.ne.s32.totalorder %s749_s22, 0 }
  0x3e   : > { %v188_v6 = vrot.slane %v187_v4, 4  ;;  %v237_v38 = vsub.s32 %v234_v35, %v236_v36  ;;  %s548_s12 = smov [#allocation5]  }
  0x3f   : > { %v194_v5 = vsel %vm186_vm0, %v184_v3, 0.0  ;;  %p464_p11 = pnand %p463_p8, %p754_p9  ;;  %s466_s20 = sshll.u32 %s548_s12, 4  ;;  %s467_s20 = int_to_ptr.vmem [resolvable:$false] %s466_s20 }
  0x40   : > { %v195_v7 = vrot.slane %v194_v5, 4  ;;  %v189_v8 = vadd.f32 %v188_v6, %v187_v4  ;;  %s468_s25 = scalar_lea.vmem %s467_s20, 256  ;;  %p469_p7 = scmp.lt.s32.totalorder %s696_s7, %s467_s20 }
  0x41   : > { %p465_p0 = pneg %p464_p11  ;;  %p470_p13 = scmp.lt.s32.totalorder %s468_s25, %s462_s19 }
  0x42   : > { %v196_v9 = vadd.f32 %v195_v7, %v194_v5  ;;  %v190_v10 = vrot.slane %v189_v8, 2 }
  0x43   : > { %p471_p3 = por %p470_p13, %p469_p7 }
  0x44   : > { %v197_v11 = vrot.slane %v196_v9, 2  ;;  %v191_v12 = vadd.f32 %v190_v10, %v189_v8 }
  0x45   : > { %p472_p6 = pnand %p471_p3, %p465_p0 }
  0x46   : > { %v198_v13 = vadd.f32 %v197_v11, %v196_v9  ;;  %v192_v14 = vrot.slane %v191_v12, 1 }
  0x48   : > { %v199_v15 = vrot.slane %v198_v13, 1  ;;  %v193_v16 = vadd.f32 %v192_v14, %v191_v12 }
  0x4a   : > { %v200_v17 = vadd.f32 %v199_v15, %v198_v13  ;;  %424 = vrsqrt.f32 %v193_v16  ;;  %vm203_vm1 = vcmp.eq.f32.partialorder %v193_v16, inf  ;;  %v206_v22 = vand.u32 2147483648, %v193_v16 }
  0x4b   : > { %vm205_vm3 = vcmp.eq.f32.partialorder %v193_v16, 0.0 }
  0x4c   : > { %426 = vrsqrt.f32 %v200_v17  ;;  %vm210_vm2 = vcmp.eq.f32.partialorder %v200_v17, inf  ;;  %v213_v24 = vand.u32 2147483648, %v200_v17  ;;  %vm212_vm4 = vcmp.eq.f32.partialorder %v200_v17, 0.0 }
  0x54   : > { %v425_v18 = vpop.eup %424 }
  0x55   : > { %v202_v20 = vmul.f32 %v425_v18, %v193_v16 }
  0x56   : > { %v427_v19 = vpop.eup %426 }
  0x57   : > { %v209_v21 = vmul.f32 %v427_v19, %v200_v17  ;;  %v204_v23 = vsel %vm203_vm1, %v193_v16, %v202_v20 }
  0x58   : > { %v207_v26 = vsel %vm205_vm3, %v206_v22, %v204_v23 }
  0x59   : > { %v211_v25 = vsel %vm210_vm2, %v200_v17, %v209_v21  ;;  %v215_v28 = vadd.f32 1e-10, %v207_v26 }
  0x5a   : > { %v214_v27 = vsel %vm212_vm4, %v213_v24, %v211_v25 }
  0x5b   : > { %v216_v29 = vadd.f32 1e-10, %v214_v27  ;;  %428 = vrcp.f32 %v215_v28 }
  0x5d   : > { %430 = vrcp.f32 %v216_v29 }
  0x65   : > { %v429_v33 = vpop.eup %428 }
  0x67   : > { %v431_v34 = vpop.eup %430 }
  0x68   : > { %v221_v37 = vcombine.low %v429_v33, %v431_v34 }
  0x6a   : > { %v223_v39 = vmul.f32 %v221_v37, %v180_v1 }
  0xac   : > { %v230_v40 = vpop.permute.xlu0 %229 }
  0xad   : > { %v238_v41 = vrot.slane %v230_v40, %v237_v38 }
  0xaf   : > { %v240_v42 = vmul.f32 %v238_v41, %v223_v39 }
  0xb1   : > { %241 = vst [vmem:[%s177_s6] sm:$0xff] %v240_v42 }
  0xb2   : > { %475 = shalt.err (!%p472_p6)
}
  0xb3   : > { %s476_s26 = scalar_lea.hbm %s694_s16, 128  ;;  %s480_s29 = scalar_lea.hbm %s745_s2, 256 }
  0xb4   : > { %p477_p4 = scmp.ne.s32.totalorder %s694_s16, %s476_s26  ;;  %p481_p1 = scmp.lt.u32.totalorder %s694_s16, %s745_s2 }
  0xb5   : > { %p482_p2 = scmp.lt.u32.totalorder %s480_s29, %s476_s26  ;;  %p484_p8 = scmp.lt.u32.totalorder %s476_s26, %s694_s16 }
  0xb6   : > { %p478_p10 = pnand %p477_p4, %p754_p9 }
  0xb7   : > { %p483_p5 = por %p482_p2, %p481_p1 }
  0xb8   : > { %p479_p12 = pneg %p478_p10 }
  0xb9   : > { %p485_p11 = por %p484_p8, %p483_p5 }
  0xbb   : > { %p486_p0 = pnand %p485_p11, %p479_p12 }
  0xbd   : > { %489 = shalt.err (!%p486_p0)
}
  0xbe   : > { %363 = dma.vmem_to_hbm [thread:$0]  (%p754_p9), %s696_s7, 128, %s694_s16, %s243_s18  }
  0xbf PF: > { %s271_s30 = sand.u32 1, %s524_s9   ;;  %p755_p7 = scmp.ne.s32.totalorder %s750_s24, 0 }
  0xc0   : > { %p756_p13 = scmp.ge.s32.totalorder %s544_s14, 2  ;;  %s272_s4 = scalar_lea.sflag [#allocation4], %s271_s30 }
  0xc2   : > { %p370_p3 = pnand %p756_p13, %p755_p7 }
  0xc4   : > { %519 = dma.done.wait (!%p370_p3), %s272_s4, 128  }
  0xc5   : > { %521 = vsyncadd (!%p370_p3), %s272_s4, 4294967168  ;;  %s18_s14 = sadd.s32 1, %s544_s14   ;;  %s757_s9 = smov %s528_s10 }
  0xc6   : > { %p15_p6 = scmp.ge.s32.totalorder %s18_s14, 4   ;;  %s758_s10 = smov %s532_s11 }
  0xc7   : > { %s759_s11 = smov %s620_s23  ;;  %s760_s12 = smov %s540_s13 }
  0xc8   : > { %s761_s13 = smov %s763_s17  ;;  %17 = sbr.rel (!%p15_p6) target bundleno = 6 (0x6), region = 73 }
  0xcf   :  { %277 = vsyncpa [#allocation3], 1 }
  0xd0   :  { %279 = vsyncpa [#allocation3 + $0x1], 1 }
  0xd1   :  { %280 = vsyncpa [#allocation4], 1 }
  0xd2   :  { %282 = vsyncpa [#allocation4 + $0x1], 1 }

</bundles_post_ra>
